<compile_context>
chip_gen: v6e
topology: v6e:2x2x1
jax: 0.10.0
libtpu: 0.0.40
codegen_flags: <defaults>
</compile_context>

<pallas_src>
import functools

import jax
import jax.numpy as jnp
from jax.experimental import pallas as pl
from jax.experimental.pallas import tpu as pltpu


# ---------------------------------------------------------------------------
# small helpers
# ---------------------------------------------------------------------------
def _round_up(x, m):
    return (x + m - 1) // m * m


def _pad2d(x, rows, cols):
    r, c = x.shape
    if r == rows and c == cols:
        return x
    return jnp.pad(x, ((0, rows - r), (0, cols - c)))


def _vmem_capacity_bytes():
    """Generation-aware physical VMEM size; conservative 64 MiB fallback."""
    try:
        info = pltpu.get_tpu_info()
        cap = getattr(info, "vmem_capacity_bytes", None)
        if cap:
            return int(cap)
    except Exception:
        pass
    return 64 * 1024 * 1024  # v7x-sized conservative default


def _pick_row_tile(n_pad, max_tile=512):
    """Largest row tile <= max_tile that divides n_pad and leaves >= 2 row
    tiles (so v7x megacore can shard rows). n_pad is a multiple of 128."""
    q = n_pad // 128
    best = 128
    for d in range(1, q + 1):
        if q % d != 0:
            continue
        t = 128 * d
        if t > max_tile:
            continue
        if (q // d) >= 2 or q == 1:
            best = t
    return best


def _pick_k_tile(n_pad, max_tile=2048):
    """Largest reduction tile <= max_tile that divides n_pad."""
    q = n_pad // 128
    best = 128
    for d in range(1, q + 1):
        if q % d == 0 and 128 * d <= max_tile:
            best = 128 * d
    return best


# ---------------------------------------------------------------------------
# Fused kernel: whole forward pass, everything VMEM-resident (small graphs)
# ---------------------------------------------------------------------------
def _fused_forward_kernel(*refs, num_in, relu_flags, num_vsgc):
    # refs = (adj, x, w_0..w_{num_in-1}, w_vsgc, out)
    adj_ref = refs[0]
    x_ref = refs[1]
    w_refs = refs[2:2 + num_in]
    wv_ref = refs[2 + num_in]
    out_ref = refs[3 + num_in]

    adj = adj_ref[...]                       # bf16 [n_pad, n_pad]
    h = x_ref[...]                           # bf16 [n_pad, f_pad]

    # GCN input layers: h = act( A_hat @ (h @ W) )
    for i in range(num_in):
        xw = jnp.dot(h, w_refs[i][...], preferred_element_type=jnp.float32)
        hp = jnp.dot(adj, xw.astype(jnp.bfloat16),
                     preferred_element_type=jnp.float32)
        if relu_flags[i]:
            hp = jnp.maximum(hp, 0.0)
        h = hp.astype(jnp.bfloat16)

    # VSGC: h0 = h @ Wv ; h_l = (l/(l+1)) * (A_hat @ h_{l-1}) + (1/(l+1)) * h0
    h0 = jnp.dot(h, wv_ref[...], preferred_element_type=jnp.float32)
    hc = h0
    for l in range(1, num_vsgc + 1):
        prop = jnp.dot(adj, hc.astype(jnp.bfloat16),
                       preferred_element_type=jnp.float32)
        hc = (float(l) / (l + 1.0)) * prop + (1.0 / (l + 1.0)) * h0

    out_ref[...] = hc.astype(out_ref.dtype)


# ---------------------------------------------------------------------------
# Streaming kernels (fallback for graphs whose A_hat does not fit in VMEM)
# ---------------------------------------------------------------------------
def _xw_kernel(x_ref, w_ref, out_ref):
    """Feature transform: out = x @ W (bf16 in, bf16/f32 out), row-tiled."""
    out_ref[...] = jnp.dot(
        x_ref[...], w_ref[...], preferred_element_type=jnp.float32
    ).astype(out_ref.dtype)


def _prop_kernel(*refs, mode, step, tk):
    """acc += A_tile @ h[k-slab] over k (A streamed, h fully VMEM-resident).

    mode == "relu":  out = relu(acc)
    mode == "none":  out = acc
    mode == "vsgc":  out = (l/(l+1)) * acc + (1/(l+1)) * h0   (VSGC step l)
    """
    if mode == "vsgc":
        adj_ref, h_ref, h0_ref, out_ref, acc_ref = refs
    else:
        adj_ref, h_ref, out_ref, acc_ref = refs
        h0_ref = None

    k = pl.program_id(1)

    @pl.when(k == 0)
    def _init():
        acc_ref[...] = jnp.zeros_like(acc_ref)

    kstart = pl.multiple_of(k * tk, tk)
    h_slab = h_ref[pl.ds(kstart, tk), :]
    acc_ref[...] += jnp.dot(adj_ref[...], h_slab,
                            preferred_element_type=jnp.float32)

    @pl.when(k == pl.num_programs(1) - 1)
    def _finalize():
        acc = acc_ref[...]
        if mode == "relu":
            acc = jnp.maximum(acc, 0.0)
        elif mode == "vsgc":
            l = float(step)
            acc = (l / (l + 1.0)) * acc + (1.0 / (l + 1.0)) * \
                h0_ref[...].astype(jnp.float32)
        out_ref[...] = acc.astype(out_ref.dtype)


def feature_transform(h_bf16, w_bf16, *, tm, out_dtype=jnp.bfloat16):
    """h: [n_pad, f_pad] bf16, w: [f_pad, c_pad] bf16 -> [n_pad, c_pad]."""
    n_pad, f_pad = h_bf16.shape
    f_pad2, c_pad = w_bf16.shape
    assert f_pad == f_pad2
    assert n_pad % tm == 0 and f_pad % 128 == 0 and c_pad % 128 == 0

    out_bytes = jnp.dtype(out_dtype).itemsize
    return pl.pallas_call(
        _xw_kernel,
        out_shape=jax.ShapeDtypeStruct((n_pad, c_pad), out_dtype),
        grid_spec=pltpu.PrefetchScalarGridSpec(
            num_scalar_prefetch=0,
            grid=(n_pad // tm,),
            in_specs=[
                pl.BlockSpec((tm, f_pad), lambda i: (i, 0)),
                pl.BlockSpec((f_pad, c_pad), lambda i: (0, 0)),
            ],
            out_specs=pl.BlockSpec((tm, c_pad), lambda i: (i, 0)),
        ),
        compiler_params=pltpu.CompilerParams(
            dimension_semantics=("parallel",)),
        cost_estimate=pl.CostEstimate(
            flops=2 * n_pad * f_pad * c_pad,
            transcendentals=0,
            bytes_accessed=n_pad * f_pad * 2 + f_pad * c_pad * 2
            + n_pad * c_pad * out_bytes,
        ),
    )(h_bf16, w_bf16)


def propagate(adj_bf16, h_bf16, *, tm, tk, mode="none", h0=None, step=None,
              out_dtype=jnp.bfloat16, vmem_cap=64 * 1024 * 1024):
    """A_hat @ h streamed over (row tiles, k tiles), h fully VMEM-resident."""
    n_pad = adj_bf16.shape[0]
    c_pad = h_bf16.shape[1]
    assert adj_bf16.shape == (n_pad, n_pad)
    assert h_bf16.shape[0] == n_pad
    assert n_pad % tm == 0 and n_pad % tk == 0 and c_pad % 128 == 0

    in_specs = [
        pl.BlockSpec((tm, tk), lambda i, k: (i, k)),          # adjacency tile
        pl.BlockSpec((n_pad, c_pad), lambda i, k: (0, 0)),    # h, resident
    ]
    inputs = [adj_bf16, h_bf16]
    if mode == "vsgc":
        in_specs.append(pl.BlockSpec((tm, c_pad), lambda i, k: (i, 0)))  # h0
        inputs.append(h0)

    out_bytes = jnp.dtype(out_dtype).itemsize
    vmem_need = (
        2 * tm * tk * 2                 # adjacency tiles (double buffered)
        + 2 * n_pad * c_pad * 2         # resident h (headroom for 2 buffers)
        + 2 * tm * c_pad * out_bytes    # output tiles
        + (2 * tm * c_pad * 2 if mode == "vsgc" else 0)
        + tm * c_pad * 4                # f32 accumulator scratch
    )
    vmem_limit = int(min(0.9 * vmem_cap,
                         max(32 * 1024 * 1024, 2 * vmem_need)))

    kernel = functools.partial(_prop_kernel, mode=mode, step=step, tk=tk)
    bytes_accessed = (n_pad * n_pad * 2            # A streamed once
                      + n_pad * c_pad * 2          # h read once (resident)
                      + n_pad * c_pad * out_bytes  # output
                      + (n_pad * c_pad * 2 if mode == "vsgc" else 0))
    return pl.pallas_call(
        kernel,
        out_shape=jax.ShapeDtypeStruct((n_pad, c_pad), out_dtype),
        grid_spec=pltpu.PrefetchScalarGridSpec(
            num_scalar_prefetch=0,
            grid=(n_pad // tm, n_pad // tk),       # reduction axis last
            in_specs=in_specs,
            out_specs=pl.BlockSpec((tm, c_pad), lambda i, k: (i, 0)),
            scratch_shapes=[pltpu.VMEM((tm, c_pad), jnp.float32)],
        ),
        compiler_params=pltpu.CompilerParams(
            dimension_semantics=("parallel", "arbitrary"),
            vmem_limit_bytes=vmem_limit,
        ),
        cost_estimate=pl.CostEstimate(
            flops=2 * n_pad * n_pad * c_pad,
            transcendentals=0,
            bytes_accessed=bytes_accessed,
        ),
    )(*inputs)


# ---------------------------------------------------------------------------
# VMixNet forward
# ---------------------------------------------------------------------------
def vmix_net_forward(adj_hat, features, params, num_vsgc, *,
                     force_streaming=False):
    n = adj_hat.shape[0]
    in_ws = params["in_weights"]
    wv = params["vsgc_weight"]
    num_classes = wv.shape[1]
    n_in = len(in_ws)

    # Pad only to multiples of 128 (not to the tile) -- the A stream is N^2.
    n_pad = _round_up(n, 128)
    f_pad = _round_up(features.shape[1], 128)

    adj_p = _pad2d(adj_hat.astype(jnp.float32), n_pad, n_pad).astype(jnp.bfloat16)
    x_p = _pad2d(features.astype(jnp.float32), n_pad, f_pad).astype(jnp.bfloat16)

    # Constructor semantics: relu on the single layer when num_inLayer == 1,
    # relu on all but the last layer when num_inLayer >= 2.
    relu_flags = tuple(True if n_in == 1 else (i < n_in - 1)
                       for i in range(n_in))

    w_pads = []
    for w in in_ws:
        w_pads.append(_pad2d(w.astype(jnp.float32),
                             _round_up(w.shape[0], 128),
                             _round_up(w.shape[1], 128)).astype(jnp.bfloat16))
    wv_p = _pad2d(wv.astype(jnp.float32),
                  _round_up(wv.shape[0], 128),
                  _round_up(wv.shape[1], 128)).astype(jnp.bfloat16)
    c_pad = wv_p.shape[1]

    vmem_cap = _vmem_capacity_bytes()

    hid_widths = [wp.shape[1] for wp in w_pads]
    max_w = max([f_pad, c_pad] + hid_widths)
    weight_bytes = sum(wp.size * 2 for wp in w_pads) + wv_p.size * 2
    # Conservative resident-footprint estimate for the fused kernel
    # (inputs + output + a few f32 temporaries of the widest h).
    est = (2 * n_pad * n_pad * 2
           + 2 * n_pad * f_pad * 2
           + 2 * weight_bytes
           + 2 * n_pad * c_pad * 4
           + 6 * n_pad * max_w * 4)
    use_fused = (not force_streaming) and est <= int(0.75 * vmem_cap)

    if use_fused:
        kernel = functools.partial(_fused_forward_kernel, num_in=n_in,
                                   relu_flags=relu_flags, num_vsgc=num_vsgc)
        prop_flops = 2 * n_pad * n_pad * (sum(hid_widths) + num_vsgc * c_pad)
        xw_flops = 2 * n_pad * (sum(wp.shape[0] * wp.shape[1] for wp in w_pads)
                                + wv_p.shape[0] * c_pad)
        out = pl.pallas_call(
            kernel,
            out_shape=jax.ShapeDtypeStruct((n_pad, c_pad), jnp.float32),
            compiler_params=pltpu.CompilerParams(
                vmem_limit_bytes=int(min(0.9 * vmem_cap,
                                         max(32 * 1024 * 1024, 2 * est))),
            ),
            cost_estimate=pl.CostEstimate(
                flops=prop_flops + xw_flops,
                transcendentals=0,
                bytes_accessed=n_pad * n_pad * 2 + n_pad * f_pad * 2
                + weight_bytes + n_pad * c_pad * 4,
            ),
        )(adj_p, x_p, *w_pads, wv_p)
        return out[:n, :num_classes]

    # ---- streaming fallback: A_hat too large for VMEM residency ----
    tm = _pick_row_tile(n_pad)
    tk = _pick_k_tile(n_pad)

    h = x_p  # bf16 throughout; no boundary casts between kernels
    for i, w_p in enumerate(w_pads):
        xw = feature_transform(h, w_p, tm=tm, out_dtype=jnp.bfloat16)
        h = propagate(adj_p, xw, tm=tm, tk=tk,
                      mode="relu" if relu_flags[i] else "none",
                      out_dtype=jnp.bfloat16, vmem_cap=vmem_cap)

    h0 = feature_transform(h, wv_p, tm=tm, out_dtype=jnp.bfloat16)
    h = h0
    for l in range(1, num_vsgc + 1):
        is_last = l == num_vsgc
        h = propagate(adj_p, h, tm=tm, tk=tk, mode="vsgc", h0=h0, step=l,
                      out_dtype=jnp.float32 if is_last else jnp.bfloat16,
                      vmem_cap=vmem_cap)

    out = h.astype(jnp.float32) if h.dtype != jnp.float32 else h
    return out[:n, :num_classes]


# ---------------------------------------------------------------------------
# Pure-JAX references
# ---------------------------------------------------------------------------
def vmix_net_reference_bf16(adj_hat, features, params, num_vsgc):
    """Matches the fused kernel's rounding points (bf16 operands, f32 acc)."""
    bf = jnp.bfloat16
    a = adj_hat.astype(bf)
    h = features.astype(bf)
    in_ws = params["in_weights"]
    n_in = len(in_ws)
    for i, w in enumerate(in_ws):
        relu = True if n_in == 1 else (i < n_in - 1)
        xw = jnp.dot(h, w.astype(bf), preferred_element_type=jnp.float32)
        hp = jnp.dot(a, xw.astype(bf), preferred_element_type=jnp.float32)
        if relu:
            hp = jnp.maximum(hp, 0.0)
        h = hp.astype(bf)
    wv = params["vsgc_weight"]
    h0 = jnp.dot(h, wv.astype(bf), preferred_element_type=jnp.float32)
    hc = h0
    for l in range(1, num_vsgc + 1):
        prop = jnp.dot(a, hc.astype(bf), preferred_element_type=jnp.float32)
        hc = (float(l) / (l + 1.0)) * prop + (1.0 / (l + 1.0)) * h0
    return hc


def vmix_net_reference_f32(adj_hat, features, params, num_vsgc):
    h = features
    in_ws = params["in_weights"]
    n_in = len(in_ws)
    for i, w in enumerate(in_ws):
        relu = True if n_in == 1 else (i < n_in - 1)
        h = adj_hat @ (h @ w)
        if relu:
            h = jnp.maximum(h, 0.0)
    h0 = h @ params["vsgc_weight"]
    h = h0
    for l in range(1, num_vsgc + 1):
        h = (l * (adj_hat @ h) + h0) / (l + 1)
    return h


# ---------------------------------------------------------------------------
# Deterministic setup + run
# ---------------------------------------------------------------------------
def make_ring_adj_hat(n):
    """Ring graph with self-loops, D^-1/2 (A+I) D^-1/2 normalization."""
    idx = jnp.arange(n)
    a = jnp.zeros((n, n), jnp.float32)
    a = a.at[idx, (idx + 1) % n].set(1.0)
    a = a.at[idx, (idx - 1) % n].set(1.0)
    a = a + jnp.eye(n, dtype=jnp.float32)
    deg = a.sum(axis=1)
    d_inv_sqrt = 1.0 / jnp.sqrt(deg)
    return a * d_inv_sqrt[:, None] * d_inv_sqrt[None, :]


def glorot(key, shape):
    fan_in, fan_out = shape
    limit = (6.0 / (fan_in + fan_out)) ** 0.5
    return jax.random.uniform(key, shape, jnp.float32, -limit, limit)


if __name__ == "__main__":
    # Small, module-consistent shapes.
    num_nodes = 16
    num_feats = 8
    num_hidden = 32
    num_classes = 4
    num_vsgc = 2

    key = jax.random.PRNGKey(0)
    k_x, k_w0, k_wv = jax.random.split(key, 3)

    features = jax.random.normal(k_x, (num_nodes, num_feats), jnp.float32)
    adj_hat = make_ring_adj_hat(num_nodes)

    params = {
        "in_weights": [glorot(k_w0, (num_feats, num_hidden))],   # num_inLayer=1
        "vsgc_weight": glorot(k_wv, (num_hidden, num_classes)),
    }

    # Fused resident-A path (default for small graphs).
    out_fused = jax.block_until_ready(
        vmix_net_forward(adj_hat, features, params, num_vsgc))
    # Streaming fallback path, exercised explicitly so both kernels run.
    out_stream = jax.block_until_ready(
        vmix_net_forward(adj_hat, features, params, num_vsgc,
                         force_streaming=True))

    assert out_fused.shape == (num_nodes, num_classes)
    assert out_stream.shape == (num_nodes, num_classes)

    ref_bf16 = vmix_net_reference_bf16(adj_hat, features, params, num_vsgc)
    ref_f32 = vmix_net_reference_f32(adj_hat, features, params, num_vsgc)

    assert jnp.allclose(out_fused, ref_bf16, atol=2e-3, rtol=2e-3), \
        "fused path mismatch vs matched bf16 reference"
    assert jnp.allclose(out_fused, ref_f32, atol=5e-2, rtol=5e-2), \
        "fused path mismatch vs f32 reference"
    assert jnp.allclose(out_stream, ref_f32, atol=5e-2, rtol=5e-2), \
        "streaming path mismatch vs f32 reference"
    assert jnp.allclose(out_stream, out_fused, atol=2e-2, rtol=2e-2), \
        "streaming vs fused mismatch"

    print("KERNEL_OK")
</pallas_src>

<mosaic_0001>
module attributes {stable_mosaic.version = 11 : i64} {
  func.func @_fused_forward_kernel(%arg0: memref<128x128xbf16, #tpu.memory_space<vmem>>, %arg1: memref<128x128xbf16, #tpu.memory_space<vmem>>, %arg2: memref<128x128xbf16, #tpu.memory_space<vmem>>, %arg3: memref<128x128xbf16, #tpu.memory_space<vmem>>, %arg4: memref<128x128xf32, #tpu.memory_space<vmem>>) attributes {dimension_semantics = [], scalar_prefetch = 0 : i64, scratch_operands = 0 : i64, tpu.core_type = #tpu.core_type<tc>} {
    %c0 = arith.constant 0 : index
    %c0_0 = arith.constant 0 : index
    %0 = vector.load %arg0[%c0, %c0_0] : memref<128x128xbf16, #tpu.memory_space<vmem>>, vector<128x128xbf16>
    %c0_1 = arith.constant 0 : index
    %c0_2 = arith.constant 0 : index
    %1 = vector.load %arg1[%c0_1, %c0_2] : memref<128x128xbf16, #tpu.memory_space<vmem>>, vector<128x128xbf16>
    %c0_3 = arith.constant 0 : index
    %c0_4 = arith.constant 0 : index
    %2 = vector.load %arg2[%c0_3, %c0_4] : memref<128x128xbf16, #tpu.memory_space<vmem>>, vector<128x128xbf16>
    %cst = arith.constant dense<0.000000e+00> : vector<128x128xf32>
    %3 = tpu.matmul %1, %2, %cst {dimension_numbers = #tpu.dot_dimension_numbers<[1], [0], [0], [1], [0, 0, 1, 1], [], []>} : vector<128x128xbf16>, vector<128x128xbf16>, vector<128x128xf32> -> vector<128x128xf32>
    %4 = arith.truncf %3 : vector<128x128xf32> to vector<128x128xbf16>
    %cst_5 = arith.constant dense<0.000000e+00> : vector<128x128xf32>
    %5 = tpu.matmul %0, %4, %cst_5 {dimension_numbers = #tpu.dot_dimension_numbers<[1], [0], [0], [1], [0, 0, 1, 1], [], []>} : vector<128x128xbf16>, vector<128x128xbf16>, vector<128x128xf32> -> vector<128x128xf32>
    %cst_6 = arith.constant 0.000000e+00 : f32
    %6 = vector.broadcast %cst_6 : f32 to vector<128x128xf32>
    %7 = arith.maximumf %5, %6 : vector<128x128xf32>
    %8 = arith.truncf %7 : vector<128x128xf32> to vector<128x128xbf16>
    %c0_7 = arith.constant 0 : index
    %c0_8 = arith.constant 0 : index
    %9 = vector.load %arg3[%c0_7, %c0_8] : memref<128x128xbf16, #tpu.memory_space<vmem>>, vector<128x128xbf16>
    %cst_9 = arith.constant dense<0.000000e+00> : vector<128x128xf32>
    %10 = tpu.matmul %8, %9, %cst_9 {dimension_numbers = #tpu.dot_dimension_numbers<[1], [0], [0], [1], [0, 0, 1, 1], [], []>} : vector<128x128xbf16>, vector<128x128xbf16>, vector<128x128xf32> -> vector<128x128xf32>
    %11 = arith.truncf %10 : vector<128x128xf32> to vector<128x128xbf16>
    %cst_10 = arith.constant dense<0.000000e+00> : vector<128x128xf32>
    %12 = tpu.matmul %0, %11, %cst_10 {dimension_numbers = #tpu.dot_dimension_numbers<[1], [0], [0], [1], [0, 0, 1, 1], [], []>} : vector<128x128xbf16>, vector<128x128xbf16>, vector<128x128xf32> -> vector<128x128xf32>
    %cst_11 = arith.constant 5.000000e-01 : f32
    %13 = vector.broadcast %cst_11 : f32 to vector<128x128xf32>
    %14 = arith.mulf %13, %12 : vector<128x128xf32>
    %cst_12 = arith.constant 5.000000e-01 : f32
    %15 = vector.broadcast %cst_12 : f32 to vector<128x128xf32>
    %16 = arith.mulf %15, %10 : vector<128x128xf32>
    %17 = arith.addf %14, %16 : vector<128x128xf32>
    %18 = arith.truncf %17 : vector<128x128xf32> to vector<128x128xbf16>
    %cst_13 = arith.constant dense<0.000000e+00> : vector<128x128xf32>
    %19 = tpu.matmul %0, %18, %cst_13 {dimension_numbers = #tpu.dot_dimension_numbers<[1], [0], [0], [1], [0, 0, 1, 1], [], []>} : vector<128x128xbf16>, vector<128x128xbf16>, vector<128x128xf32> -> vector<128x128xf32>
    %cst_14 = arith.constant 0.666666686 : f32
    %20 = vector.broadcast %cst_14 : f32 to vector<128x128xf32>
    %21 = arith.mulf %20, %19 : vector<128x128xf32>
    %cst_15 = arith.constant 0.333333343 : f32
    %22 = vector.broadcast %cst_15 : f32 to vector<128x128xf32>
    %23 = arith.mulf %22, %10 : vector<128x128xf32>
    %24 = arith.addf %21, %23 : vector<128x128xf32>
    %c0_16 = arith.constant 0 : index
    %c0_17 = arith.constant 0 : index
    %25 = vector.load %arg4[%c0_16, %c0_17] : memref<128x128xf32, #tpu.memory_space<vmem>>, vector<128x128xf32>
    tpu.vector_store %arg4[%c0_16, %c0_17], %24 {strides = array<i32>} : memref<128x128xf32, #tpu.memory_space<vmem>>, vector<128x128xf32>,
    return
  }
}

</mosaic_0001>

<bundles_post_ra>
// kernel: tpu_custom_call.1
= control target key start
LH: loop header
LB: loop body
LE: loop exit
PB: predicated region body
PF: predicated region fallthrough
CT: control target
= control target key end

     0   :  { %9 = vsyncpa [#allocation3], 0  ;;  %s1624_s0 = inlined_call_operand.hbm [shape: bf16[128,128], index: 0, kind: input, shape index: {}]   ;;  %s1625_s1 = inlined_call_operand.hbm [shape: bf16[128,128], index: 1, kind: input, shape index: {}]   ;;  %s1626_s2 = inlined_call_operand.hbm [shape: bf16[128,128], index: 2, kind: input, shape index: {}]   ;;  %s1627_s3 = inlined_call_operand.hbm [shape: bf16[128,128], index: 3, kind: input, shape index: {}]   ;;  %s1628_s4 = inlined_call_operand.hbm [shape: f32[128,128], index: 4, kind: output, shape index: {}]  }
   0x1   :  { %10 = vsyncpa [#allocation6], 0 }
   0x2   :  { %11 = vsyncpa [#allocation9], 0 }
   0x3   :  { %12 = vsyncpa [#allocation4], 0  ;;  %s1431_s15 = smov [#allocation5]   ;;  %s1432_s17 = smov [#allocation2]  }
   0x4   :  { %s30_s16 = sshll.u32 %s1431_s15, 4  ;;  %s18_s18 = sshll.u32 %s1432_s17, 4  ;;  %s31_s16 = int_to_ptr.vmem [resolvable:$true] %s30_s16  ;;  %s19_s18 = int_to_ptr.vmem [resolvable:$true] %s18_s18 }
   0x5   :  { %s1331_s19 = scalar_lea.vmem %s31_s16, 1024  ;;  %p1336_p1 = scmp.lt.s32.totalorder %s31_s16, %s31_s16 }
   0x6   :  { %p1332_p0 = scmp.ne.s32.totalorder %s31_s16, %s1331_s19  ;;  %p1337_p2 = scmp.lt.s32.totalorder %s1331_s19, %s1331_s19 }
   0x8   :  { %p1338_p3 = por %p1337_p2, %p1336_p1 }
   0xa   :  { %p1339_p4 = pnand %p1338_p3, %p1332_p0 }
   0xc   :  { %1342 = shalt.err (!%p1339_p4)
}
   0xd   :  { %s1433_s20 = smov 64   ;;  %s1434_s21 = smov 4  }
   0xe   :  { %36 = dma.hbm_to_vmem [thread:$0]  %s1625_s1, 1024, %s31_s16, [#allocation6], %s1433_s20, %s1433_s20, %s1434_s21  }
   0xf   :  { %s1351_s24 = scalar_lea.vmem %s19_s18, 1024  ;;  %p1356_p6 = scmp.lt.s32.totalorder %s19_s18, %s19_s18 }
  0x10   :  { %p1352_p5 = scmp.ne.s32.totalorder %s19_s18, %s1351_s24  ;;  %p1357_p7 = scmp.lt.s32.totalorder %s1351_s24, %s1351_s24 }
  0x12   :  { %p1358_p8 = por %p1357_p7, %p1356_p6 }
  0x14   :  { %p1359_p9 = pnand %p1358_p8, %p1352_p5 }
  0x16   :  { %1362 = shalt.err (!%p1359_p9)
}
  0x17   :  { %24 = dma.hbm_to_vmem [thread:$0]  %s1624_s0, 1024, %s19_s18, [#allocation3], %s1433_s20, %s1433_s20, %s1434_s21  }
  0x18   :  { %s1435_s27 = smov [#allocation7]   ;;  %s1436_s29 = smov [#allocation8]  }
  0x19   :  { %s42_s28 = sshll.u32 %s1435_s27, 4  ;;  %s54_s30 = sshll.u32 %s1436_s29, 4  ;;  %s43_s28 = int_to_ptr.vmem [resolvable:$true] %s42_s28  ;;  %s55_s30 = int_to_ptr.vmem [resolvable:$true] %s54_s30 }
  0x1a   :  { %s1371_s1 = scalar_lea.vmem %s43_s28, 1024  ;;  %p1376_p11 = scmp.lt.s32.totalorder %s43_s28, %s43_s28 }
  0x1b   :  { %p1372_p10 = scmp.ne.s32.totalorder %s43_s28, %s1371_s1  ;;  %p1377_p12 = scmp.lt.s32.totalorder %s1371_s1, %s1371_s1 }
  0x1d   :  { %p1378_p13 = por %p1377_p12, %p1376_p11 }
  0x1f   :  { %p1379_p0 = pnand %p1378_p13, %p1372_p10 }
  0x21   :  { %1382 = shalt.err (!%p1379_p0)
}
  0x22   :  { %48 = dma.hbm_to_vmem [thread:$0]  %s1626_s2, 1024, %s43_s28, [#allocation6], %s1433_s20, %s1433_s20, %s1434_s21  }
  0x23   :  { %s1391_s0 = scalar_lea.vmem %s55_s30, 1024  ;;  %p1396_p2 = scmp.lt.s32.totalorder %s55_s30, %s55_s30 }
  0x24   :  { %p1392_p1 = scmp.ne.s32.totalorder %s55_s30, %s1391_s0  ;;  %p1397_p3 = scmp.lt.s32.totalorder %s1391_s0, %s1391_s0 }
  0x26   :  { %p1398_p4 = por %p1397_p3, %p1396_p2 }
  0x28   :  { %p1399_p5 = pnand %p1398_p4, %p1392_p1 }
  0x2a   :  { %1402 = shalt.err (!%p1399_p5)
}
  0x2b   :  { %60 = dma.hbm_to_vmem [thread:$0]  %s1627_s3, 1024, %s55_s30, [#allocation9], %s1433_s20, %s1433_s20, %s1434_s21  }
  0x2c   :  { %1423 = dma.done.wait [#allocation3], 1024  }
  0x2d   :  { %1424 = vsyncadd [#allocation3], 4294966272 }
  0x2e   :  { %1425 = dma.done.wait [#allocation6], 2048  }
  0x2f   :  { %1426 = vsyncadd [#allocation6], 4294965248 }
  0x30   :  { %1427 = dma.done.wait [#allocation9], 1024  }
  0x31   :  { %1428 = vsyncadd [#allocation9], 4294966272  ;;  %v1291_v0 = vld [vmem:[#allocation7 + $0x38] sm:$0xff]   ;;  %v1292_v1 = vld [vmem:[#allocation7 + $0x30] sm:$0xff]   ;;  %s1437_s2 = smov [#allocation10]  }
  0x32   :  { %1106 = vmatprep.subr.bf16.mxu0 %v1291_v0  ;;  %v1293_v2 = vld [vmem:[#allocation7 + $0x28] sm:$0xff]   ;;  %v1294_v3 = vld [vmem:[#allocation7 + $0x20] sm:$0xff]   ;;  %v1295_v5 = vld [vmem:[#allocation7 + $0x18] sm:$0xff]   ;;  %s980_s3 = sshll.u32 %s1437_s2, 4  ;;  %s981_s3 = int_to_ptr.vmem [resolvable:$true] %s980_s3 }
  0x33   :  { %1107 = vmatpush3.bf16.msra.mxu0 %v1291_v0  ;;  %v1299_v4 = vld [vmem:[#allocation5] sm:$0xff]   ;;  %v1296_v6 = vld [vmem:[#allocation7 + $0x10] sm:$0xff]   ;;  %v1297_v7 = vld [vmem:[#allocation7 + $0x8] sm:$0xff]   ;;  %s1403_s9 = scalar_lea.vmem %s981_s3, 2048  ;;  %p1408_p7 = scmp.lt.s32.totalorder %s981_s3, %s981_s3 }
  0x34   :  { %1108 = vmatprep.subr.bf16.mxu0 %v1292_v1  ;;  %1122 = vmatprep.mubr.bf16.mxu0 %v1299_v4  ;;  %v1298_v8 = vld [vmem:[#allocation7] sm:$0xff]   ;;  %v1300_v9 = vld [vmem:[#allocation5 + $0x8] sm:$0xff]   ;;  %v1301_v10 = vld [vmem:[#allocation5 + $0x10] sm:$0xff]   ;;  %p1404_p6 = scmp.ne.s32.totalorder %s981_s3, %s1403_s9  ;;  %p1409_p8 = scmp.lt.s32.totalorder %s1403_s9, %s1403_s9 }
  0x35   :  { %v1302_v11 = vld [vmem:[#allocation5 + $0x18] sm:$0xff]   ;;  %v1303_v12 = vld [vmem:[#allocation5 + $0x20] sm:$0xff]   ;;  %v1304_v13 = vld [vmem:[#allocation5 + $0x28] sm:$0xff]  }
  0x36   :  { %v1305_v14 = vld [vmem:[#allocation5 + $0x30] sm:$0xff]   ;;  %v1306_v15 = vld [vmem:[#allocation5 + $0x38] sm:$0xff]   ;;  %v1489_v16 = vld [vmem:[#allocation2] sm:$0xff]   ;;  %p1410_p9 = por %p1409_p8, %p1408_p7 }
  0x37   :  { %1109 = vmatpush3.bf16.msra.mxu0 %v1292_v1  ;;  %1154 = vmatprep.mubr.bf16.mxu1 %v1489_v16  ;;  %v1315_v17 = vld [vmem:[#allocation8 + $0x38] sm:$0xff]   ;;  %v1316_v18 = vld [vmem:[#allocation8 + $0x30] sm:$0xff]   ;;  %v1317_v19 = vld [vmem:[#allocation8 + $0x28] sm:$0xff]  }
  0x38   :  { %1110 = vmatprep.subr.bf16.mxu0 %v1293_v2  ;;  %v1318_v20 = vld [vmem:[#allocation8 + $0x20] sm:$0xff]   ;;  %v1319_v21 = vld [vmem:[#allocation8 + $0x18] sm:$0xff]   ;;  %v1492_v46 = vld [vmem:[#allocation2 + $0x8] sm:$0xff]   ;;  %p1411_p10 = pnand %p1410_p9, %p1404_p6 }
  0x39   :  { %v1494_v47 = vld [vmem:[#allocation2 + $0x10] sm:$0xff]   ;;  %v1498_v48 = vld [vmem:[#allocation2 + $0x18] sm:$0xff]   ;;  %v1500_v49 = vld [vmem:[#allocation2 + $0x20] sm:$0xff]  }
  0x3a   :  { %v1504_v50 = vld [vmem:[#allocation2 + $0x28] sm:$0xff]   ;;  %v1506_v51 = vld [vmem:[#allocation2 + $0x30] sm:$0xff]   ;;  %v1510_v52 = vld [vmem:[#allocation2 + $0x38] sm:$0xff]  }
  0x3b   :  { %1111 = vmatpush3.bf16.msra.mxu0 %v1293_v2  ;;  %v1320_v53 = vld [vmem:[#allocation8 + $0x10] sm:$0xff]   ;;  %v1321_v54 = vld [vmem:[#allocation8 + $0x8] sm:$0xff]   ;;  %v1322_v55 = vld [vmem:[#allocation8] sm:$0xff]  }
  0x3c   :  { %1112 = vmatprep.subr.bf16.mxu0 %v1294_v3 }
  0x3f   :  { %1113 = vmatpush3.bf16.msra.mxu0 %v1294_v3 }
  0x40   :  { %1114 = vmatprep.subr.bf16.mxu0 %v1295_v5 }
  0x43   :  { %1115 = vmatpush3.bf16.msra.mxu0 %v1295_v5 }
  0x44   :  { %1116 = vmatprep.subr.bf16.mxu0 %v1296_v6 }
  0x47   :  { %1117 = vmatpush3.bf16.msra.mxu0 %v1296_v6 }
  0x48   :  { %1118 = vmatprep.subr.bf16.mxu0 %v1297_v7 }
  0x4b   :  { %1119 = vmatpush3.bf16.msra.mxu0 %v1297_v7 }
  0x4c   :  { %1120 = vmatprep.subr.bf16.mxu0 %v1298_v8 }
  0x4f   :  { %1121 = vmatpush3.bf16.msra.mxu0 %v1298_v8 }
  0x50   :  { %1170 = vmatprep.subr.bf16.mxu0 %v1315_v17 }
  0x52   :  { %1123 = vmatmul.mubr.bf16.vlgmr.msra.gmra.mxu0 %v1300_v9 }
  0x53   :  { %1126 = vmatprep.mubr.bf16.mxu0 %v1301_v10  ;;  %1171 = vmatpush3.bf16.msra.mxu0 %v1315_v17 }
  0x54   :  { %1172 = vmatprep.subr.bf16.mxu0 %v1316_v18 }
  0x57   :  { %1173 = vmatpush3.bf16.msra.mxu0 %v1316_v18 }
  0x58   :  { %1174 = vmatprep.subr.bf16.mxu0 %v1317_v19 }
  0x5a   :  { %1127 = vmatmul.mubr.bf16.gmra.mxu0 %v1302_v11 }
  0x5b   :  { %1130 = vmatprep.mubr.bf16.mxu0 %v1303_v12  ;;  %1175 = vmatpush3.bf16.msra.mxu0 %v1317_v19 }
  0x5c   :  { %1176 = vmatprep.subr.bf16.mxu0 %v1318_v20 }
  0x5f   :  { %1177 = vmatpush3.bf16.msra.mxu0 %v1318_v20 }
  0x60   :  { %1178 = vmatprep.subr.bf16.mxu0 %v1319_v21 }
  0x62   :  { %1131 = vmatmul.mubr.bf16.gmra.mxu0 %v1304_v13 }
  0x63   :  { %1134 = vmatprep.mubr.bf16.mxu0 %v1305_v14  ;;  %1179 = vmatpush3.bf16.msra.mxu0 %v1319_v21 }
  0x64   :  { %1180 = vmatprep.subr.bf16.mxu0 %v1320_v53 }
  0x67   :  { %1181 = vmatpush3.bf16.msra.mxu0 %v1320_v53 }
  0x68   :  { %1182 = vmatprep.subr.bf16.mxu0 %v1321_v54 }
  0x6a   :  { %1135 = vmatmul.mubr.bf16.gmra.mxu0 %v1306_v15 }
  0x6b   :  { %1183 = vmatpush3.bf16.msra.mxu0 %v1321_v54 }
  0x6c   :  { %1184 = vmatprep.subr.bf16.mxu0 %v1322_v55 }
  0x6f   :  { %1185 = vmatpush3.bf16.msra.mxu0 %v1322_v55 }
 0x112   :  { %v1124_v22 = vpop.f32.mrf.mxu0 }
 0x114   :  { %v252_v23 = vpop.f32.mrf.mxu0 }
 0x116   :  { %v1125_v24 = vpop.f32.mrf.mxu0 }
 0x117   :  { %v316_v44 = vpack.c.bf16 %v1125_v24, %v1124_v22 }
 0x118   :  { %v255_v25 = vpop.f32.mrf.mxu0 }
 0x119   :  { %v315_v45 = vpack.c.bf16 %v255_v25, %v252_v23 }
 0x11a   :  { %v1128_v26 = vpop.f32.mrf.mxu0 }
 0x11c   :  { %v268_v27 = vpop.f32.mrf.mxu0 }
 0x11e   :  { %v1129_v28 = vpop.f32.mrf.mxu0 }
 0x11f   :  { %v318_v42 = vpack.c.bf16 %v1129_v28, %v1128_v26 }
 0x120   :  { %v271_v29 = vpop.f32.mrf.mxu0 }
 0x121   :  { %v317_v43 = vpack.c.bf16 %v271_v29, %v268_v27 }
 0x122   :  { %v1132_v30 = vpop.f32.mrf.mxu0 }
 0x124   :  { %v284_v31 = vpop.f32.mrf.mxu0 }
 0x126   :  { %v1133_v32 = vpop.f32.mrf.mxu0 }
 0x127   :  { %v320_v40 = vpack.c.bf16 %v1133_v32, %v1132_v30 }
 0x128   :  { %v287_v33 = vpop.f32.mrf.mxu0 }
 0x129   :  { %v319_v41 = vpack.c.bf16 %v287_v33, %v284_v31 }
 0x12a   :  { %v1136_v34 = vpop.f32.mrf.mxu0 }
 0x12c   :  { %v300_v35 = vpop.f32.mrf.mxu0 }
 0x12e   :  { %v1137_v36 = vpop.f32.mrf.mxu0 }
 0x12f   :  { %v322_v37 = vpack.c.bf16 %v1137_v36, %v1136_v34 }
 0x130   :  { %v303_v38 = vpop.f32.mrf.mxu0 }
 0x131   :  { %v321_v39 = vpack.c.bf16 %v303_v38, %v300_v35  ;;  %1138 = vmatprep.subr.bf16.mxu1 %v322_v37 }
 0x132   :  { %1139 = vmatpush3.bf16.msra.mxu1 %v322_v37 }
 0x133   :  { %1140 = vmatprep.subr.bf16.mxu1 %v321_v39 }
 0x136   :  { %1141 = vmatpush3.bf16.msra.mxu1 %v321_v39 }
 0x137   :  { %1142 = vmatprep.subr.bf16.mxu1 %v320_v40 }
 0x13a   :  { %1143 = vmatpush3.bf16.msra.mxu1 %v320_v40 }
 0x13b   :  { %1144 = vmatprep.subr.bf16.mxu1 %v319_v41 }
 0x13e   :  { %1145 = vmatpush3.bf16.msra.mxu1 %v319_v41 }
 0x13f   :  { %1146 = vmatprep.subr.bf16.mxu1 %v318_v42 }
 0x142   :  { %1147 = vmatpush3.bf16.msra.mxu1 %v318_v42 }
 0x143   :  { %1148 = vmatprep.subr.bf16.mxu1 %v317_v43 }
 0x146   :  { %1149 = vmatpush3.bf16.msra.mxu1 %v317_v43 }
 0x147   :  { %1150 = vmatprep.subr.bf16.mxu1 %v316_v44 }
 0x14a   :  { %1151 = vmatpush3.bf16.msra.mxu1 %v316_v44 }
 0x14b   :  { %1152 = vmatprep.subr.bf16.mxu1 %v315_v45 }
 0x14e   :  { %1153 = vmatpush3.bf16.msra.mxu1 %v315_v45 }
 0x151   :  { %1155 = vmatmul.mubr.bf16.vlgmr.msra.gmra.mxu1 %v1492_v46 }
 0x152   :  { %1158 = vmatprep.mubr.bf16.mxu1 %v1494_v47 }
 0x159   :  { %1159 = vmatmul.mubr.bf16.gmra.mxu1 %v1498_v48 }
 0x15a   :  { %1162 = vmatprep.mubr.bf16.mxu1 %v1500_v49 }
 0x161   :  { %1163 = vmatmul.mubr.bf16.gmra.mxu1 %v1504_v50 }
 0x162   :  { %1166 = vmatprep.mubr.bf16.mxu1 %v1506_v51 }
 0x169   :  { %1167 = vmatmul.mubr.bf16.gmra.mxu1 %v1510_v52 }
 0x16a   :  { %1218 = vmatprep.mubr.bf16.mxu1 %v1489_v16 }
 0x211   :  { %v1156_v56 = vpop.f32.mrf.mxu1 }
 0x212   :  { %v470_v63 = vmax.f32 %v1156_v56, 0.0 }
 0x213   :  { %v405_v57 = vpop.f32.mrf.mxu1 }
 0x214   :  { %v468_v61 = vmax.f32 %v405_v57, 0.0 }
 0x215   :  { %v1157_v58 = vpop.f32.mrf.mxu1 }
 0x216   :  { %v471_v59 = vmax.f32 %v1157_v58, 0.0 }
 0x217   :  { %v408_v60 = vpop.f32.mrf.mxu1 }
 0x218   :  { %v469_v62 = vmax.f32 %v408_v60, 0.0  ;;  %v485_v2 = vpack.c.bf16 %v471_v59, %v470_v63 }
 0x219   :  { %v1160_v0 = vpop.f32.mrf.mxu1 }
 0x21a   :  { %v484_v1 = vpack.c.bf16 %v469_v62, %v468_v61  ;;  %v474_v9 = vmax.f32 %v1160_v0, 0.0 }
 0x21b   :  { %v421_v3 = vpop.f32.mrf.mxu1 }
 0x21c   :  { %1186 = vmatprep.mubr.bf16.mxu0 %v484_v1  ;;  %v472_v7 = vmax.f32 %v421_v3, 0.0 }
 0x21d   :  { %v1161_v4 = vpop.f32.mrf.mxu1  ;;  %1187 = vmatmul.mubr.bf16.vlgmr.msra.gmra.mxu0 %v485_v2 }
 0x21e   :  { %v475_v5 = vmax.f32 %v1161_v4, 0.0 }
 0x21f   :  { %v424_v6 = vpop.f32.mrf.mxu1 }
 0x220   :  { %v473_v8 = vmax.f32 %v424_v6, 0.0  ;;  %v487_v12 = vpack.c.bf16 %v475_v5, %v474_v9 }
 0x221   :  { %v1164_v10 = vpop.f32.mrf.mxu1 }
 0x222   :  { %v486_v11 = vpack.c.bf16 %v473_v8, %v472_v7  ;;  %v478_v20 = vmax.f32 %v1164_v10, 0.0 }
 0x223   :  { %v437_v13 = vpop.f32.mrf.mxu1 }
 0x224   :  { %1190 = vmatprep.mubr.bf16.mxu0 %v486_v11  ;;  %v476_v18 = vmax.f32 %v437_v13, 0.0 }
 0x225   :  { %v1165_v14 = vpop.f32.mrf.mxu1  ;;  %1191 = vmatmul.mubr.bf16.gmra.mxu0 %v487_v12 }
 0x226   :  { %v479_v15 = vmax.f32 %v1165_v14, 0.0 }
 0x227   :  { %v440_v17 = vpop.f32.mrf.mxu1 }
 0x228   :  { %v477_v19 = vmax.f32 %v440_v17, 0.0  ;;  %v489_v23 = vpack.c.bf16 %v479_v15, %v478_v20 }
 0x229   :  { %v1168_v21 = vpop.f32.mrf.mxu1 }
 0x22a   :  { %v488_v22 = vpack.c.bf16 %v477_v19, %v476_v18  ;;  %v482_v30 = vmax.f32 %v1168_v21, 0.0 }
 0x22b   :  { %v453_v24 = vpop.f32.mrf.mxu1 }
 0x22c   :  { %1194 = vmatprep.mubr.bf16.mxu0 %v488_v22  ;;  %v480_v28 = vmax.f32 %v453_v24, 0.0 }
 0x22d   :  { %v1169_v25 = vpop.f32.mrf.mxu1  ;;  %1195 = vmatmul.mubr.bf16.gmra.mxu0 %v489_v23 }
 0x22e   :  { %v483_v26 = vmax.f32 %v1169_v25, 0.0 }
 0x22f   :  { %v456_v27 = vpop.f32.mrf.mxu1 }
 0x230   :  { %v481_v29 = vmax.f32 %v456_v27, 0.0  ;;  %v491_v32 = vpack.c.bf16 %v483_v26, %v482_v30 }
 0x232   :  { %v490_v31 = vpack.c.bf16 %v481_v29, %v480_v28 }
 0x234   :  { %1198 = vmatprep.mubr.bf16.mxu0 %v490_v31 }
 0x235   :  { %1199 = vmatmul.mubr.bf16.gmra.mxu0 %v491_v32 }
 0x236   :  { %1250 = vmatprep.mubr.bf16.mxu0 %v1489_v16 }
 0x2dd   :  { %v1515_v33 = vpop.f32.mrf.mxu0 }
 0x2de   :  { %v776_v3 = vmul.f32 0.5, %v1515_v33 }
 0x2df   :  { %v1517_v34 = vpop.f32.mrf.mxu0 }
 0x2e0   :  { %v774_v7 = vmul.f32 0.5, %v1517_v34 }
 0x2e1   :  { %v1519_v35 = vpop.f32.mrf.mxu0 }
 0x2e2   :  { %v654_v61 = vpack.c.bf16 %v1519_v35, %v1515_v33  ;;  %v777_v4 = vmul.f32 0.5, %v1519_v35 }
 0x2e3   :  { %v1521_v36 = vpop.f32.mrf.mxu0 }
 0x2e4   :  { %v653_v62 = vpack.c.bf16 %v1521_v36, %v1517_v34  ;;  %v775_v9 = vmul.f32 0.5, %v1521_v36 }
 0x2e5   :  { %v1523_v37 = vpop.f32.mrf.mxu0 }
 0x2e6   :  { %v780_v21 = vmul.f32 0.5, %v1523_v37 }
 0x2e7   :  { %v1525_v38 = vpop.f32.mrf.mxu0 }
 0x2e8   :  { %v778_v25 = vmul.f32 0.5, %v1525_v38 }
 0x2e9   :  { %v1527_v39 = vpop.f32.mrf.mxu0 }
 0x2ea   :  { %v656_v59 = vpack.c.bf16 %v1527_v39, %v1523_v37  ;;  %v781_v22 = vmul.f32 0.5, %v1527_v39 }
 0x2eb   :  { %v1529_v40 = vpop.f32.mrf.mxu0 }
 0x2ec   :  { %v655_v60 = vpack.c.bf16 %v1529_v40, %v1525_v38  ;;  %v779_v27 = vmul.f32 0.5, %v1529_v40 }
 0x2ed   :  { %v1531_v41 = vpop.f32.mrf.mxu0 }
 0x2ef   :  { %v1533_v42 = vpop.f32.mrf.mxu0 }
 0x2f1   :  { %v1535_v16 = vpop.f32.mrf.mxu0 }
 0x2f2   :  { %v658_v57 = vpack.c.bf16 %v1535_v16, %v1531_v41 }
 0x2f3   :  { %v1537_v43 = vpop.f32.mrf.mxu0 }
 0x2f4   :  { %v657_v58 = vpack.c.bf16 %v1537_v43, %v1533_v42 }
 0x2f5   :  { %v1539_v44 = vpop.f32.mrf.mxu0 }
 0x2f7   :  { %v1541_v45 = vpop.f32.mrf.mxu0 }
 0x2f9   :  { %v1543_v53 = vpop.f32.mrf.mxu0 }
 0x2fa   :  { %v660_v54 = vpack.c.bf16 %v1543_v53, %v1539_v44 }
 0x2fb   :  { %v1547_v55 = vpop.f32.mrf.mxu0 }
 0x2fc   :  { %v659_v56 = vpack.c.bf16 %v1547_v55, %v1541_v45  ;;  %1202 = vmatprep.subr.bf16.mxu1 %v660_v54 }
 0x2fd   :  { %1203 = vmatpush3.bf16.msra.mxu1 %v660_v54 }
 0x2fe   :  { %1204 = vmatprep.subr.bf16.mxu1 %v659_v56 }
 0x301   :  { %1205 = vmatpush3.bf16.msra.mxu1 %v659_v56 }
 0x302   :  { %1206 = vmatprep.subr.bf16.mxu1 %v658_v57 }
 0x305   :  { %1207 = vmatpush3.bf16.msra.mxu1 %v658_v57 }
 0x306   :  { %1208 = vmatprep.subr.bf16.mxu1 %v657_v58 }
 0x309   :  { %1209 = vmatpush3.bf16.msra.mxu1 %v657_v58 }
 0x30a   :  { %1210 = vmatprep.subr.bf16.mxu1 %v656_v59 }
 0x30d   :  { %1211 = vmatpush3.bf16.msra.mxu1 %v656_v59 }
 0x30e   :  { %1212 = vmatprep.subr.bf16.mxu1 %v655_v60 }
 0x311   :  { %1213 = vmatpush3.bf16.msra.mxu1 %v655_v60 }
 0x312   :  { %1214 = vmatprep.subr.bf16.mxu1 %v654_v61 }
 0x315   :  { %1215 = vmatpush3.bf16.msra.mxu1 %v654_v61  ;;  %v784_v61 = vmul.f32 0.5, %v1531_v41 }
 0x316   :  { %1216 = vmatprep.subr.bf16.mxu1 %v653_v62 }
 0x319   :  { %1217 = vmatpush3.bf16.msra.mxu1 %v653_v62  ;;  %v785_v62 = vmul.f32 0.5, %v1535_v16 }
 0x31c   :  { %1219 = vmatmul.mubr.bf16.vlgmr.msra.gmra.mxu1 %v1492_v46 }
 0x31d   :  { %1222 = vmatprep.mubr.bf16.mxu1 %v1494_v47 }
 0x324   :  { %1223 = vmatmul.mubr.bf16.gmra.mxu1 %v1498_v48 }
 0x325   :  { %1226 = vmatprep.mubr.bf16.mxu1 %v1500_v49 }
 0x32c   :  { %1227 = vmatmul.mubr.bf16.gmra.mxu1 %v1504_v50 }
 0x32d   :  { %1230 = vmatprep.mubr.bf16.mxu1 %v1506_v51 }
 0x334   :  { %1231 = vmatmul.mubr.bf16.gmra.mxu1 %v1510_v52 }
 0x335   :  { %1258 = vmatprep.mubr.bf16.mxu1 %v1500_v49 }
 0x3dc   :  { %v1220_v63 = vpop.f32.mrf.mxu1 }
 0x3dd   :  { %v760_v1 = vmul.f32 0.5, %v1220_v63 }
 0x3de   :  { %v695_v0 = vpop.f32.mrf.mxu1 }
 0x3df   :  { %v758_v5 = vmul.f32 0.5, %v695_v0  ;;  %v792_v10 = vadd.f32 %v776_v3, %v760_v1  ;;  %v782_v1 = vmul.f32 0.5, %v1533_v42  ;;  %v783_v3 = vmul.f32 0.5, %v1537_v43 }
 0x3e0   :  { %v1221_v2 = vpop.f32.mrf.mxu1 }
 0x3e1   :  { %v761_v6 = vmul.f32 0.5, %v1221_v2  ;;  %v790_v49 = vadd.f32 %v774_v7, %v758_v5 }
 0x3e2   :  { %v698_v8 = vpop.f32.mrf.mxu1 }
 0x3e3   :  { %v793_v11 = vadd.f32 %v777_v4, %v761_v6  ;;  %v759_v12 = vmul.f32 0.5, %v698_v8 }
 0x3e4   :  { %v1224_v13 = vpop.f32.mrf.mxu1 }
 0x3e5   :  { %v1575_v14 = vpack.c.bf16 %v793_v11, %v792_v10  ;;  %v791_v15 = vadd.f32 %v775_v9, %v759_v12  ;;  %v764_v19 = vmul.f32 0.5, %v1224_v13 }
 0x3e6   :  { %v711_v17 = vpop.f32.mrf.mxu1 }
 0x3e7   :  { %v1577_v18 = vpack.c.bf16 %v791_v15, %v790_v49  ;;  %v762_v23 = vmul.f32 0.5, %v711_v17  ;;  %v796_v28 = vadd.f32 %v780_v21, %v764_v19  ;;  %v788_v15 = vmul.f32 0.5, %v1539_v44 }
 0x3e8   :  { %v1225_v20 = vpop.f32.mrf.mxu1  ;;  %v789_v17 = vmul.f32 0.5, %v1543_v53  ;;  %v786_v21 = vmul.f32 0.5, %v1541_v45 }
 0x3e9   :  { %v765_v24 = vmul.f32 0.5, %v1225_v20  ;;  %v794_v32 = vadd.f32 %v778_v25, %v762_v23  ;;  %v787_v23 = vmul.f32 0.5, %v1547_v55 }
 0x3ea   :  { %v714_v26 = vpop.f32.mrf.mxu1 }
 0x3eb   :  { %v797_v29 = vadd.f32 %v781_v22, %v765_v24  ;;  %v763_v30 = vmul.f32 0.5, %v714_v26 }
 0x3ec   :  { %v1228_v31 = vpop.f32.mrf.mxu1 }
 0x3ed   :  { %v809_v54 = vpack.c.bf16 %v797_v29, %v796_v28  ;;  %v795_v56 = vadd.f32 %v779_v27, %v763_v30  ;;  %v768_v59 = vmul.f32 0.5, %v1228_v31 }
 0x3ee   :  { %v727_v57 = vpop.f32.mrf.mxu1 }
 0x3ef   :  { %v808_v58 = vpack.c.bf16 %v795_v56, %v794_v32  ;;  %v766_v63 = vmul.f32 0.5, %v727_v57  ;;  %v800_v4 = vadd.f32 %v784_v61, %v768_v59 }
 0x3f0   :  { %v1229_v60 = vpop.f32.mrf.mxu1 }
 0x3f1   :  { %v769_v0 = vmul.f32 0.5, %v1229_v60  ;;  %v798_v8 = vadd.f32 %v782_v1, %v766_v63 }
 0x3f2   :  { %v730_v2 = vpop.f32.mrf.mxu1 }
 0x3f3   :  { %v801_v5 = vadd.f32 %v785_v62, %v769_v0  ;;  %v767_v6 = vmul.f32 0.5, %v730_v2  ;;  %v936_v0 = vmul.f32 0.33333334, %v1537_v43 }
 0x3f4   :  { %v1232_v7 = vpop.f32.mrf.mxu1 }
 0x3f5   :  { %v811_v9 = vpack.c.bf16 %v801_v5, %v800_v4  ;;  %v799_v10 = vadd.f32 %v783_v3, %v767_v6  ;;  %v772_v13 = vmul.f32 0.5, %v1232_v7  ;;  %v933_v5 = vmul.f32 0.33333334, %v1523_v37 }
 0x3f6   :  { %v743_v11 = vpop.f32.mrf.mxu1  ;;  %v941_v6 = vmul.f32 0.33333334, %v1539_v44 }
 0x3f7   :  { %v810_v12 = vpack.c.bf16 %v799_v10, %v798_v8  ;;  %v770_v19 = vmul.f32 0.5, %v743_v11  ;;  %v804_v24 = vadd.f32 %v788_v15, %v772_v13  ;;  %v931_v11 = vmul.f32 0.33333334, %v1525_v38 }
 0x3f8   :  { %v1233_v49 = vpop.f32.mrf.mxu1 }
 0x3f9   :  { %v773_v20 = vmul.f32 0.5, %v1233_v49  ;;  %v802_v27 = vadd.f32 %v786_v21, %v770_v19  ;;  %v934_v19 = vmul.f32 0.33333334, %v1527_v39 }
 0x3fa   :  { %v746_v22 = vpop.f32.mrf.mxu1 }
 0x3fb   :  { %v805_v25 = vadd.f32 %v789_v17, %v773_v20  ;;  %v771_v26 = vmul.f32 0.5, %v746_v22  ;;  %v942_v20 = vmul.f32 0.33333334, %v1543_v53 }
 0x3fd   :  { %v813_v28 = vpack.c.bf16 %v805_v25, %v804_v24  ;;  %v803_v29 = vadd.f32 %v787_v23, %v771_v26  ;;  %v932_v25 = vmul.f32 0.33333334, %v1529_v40  ;;  %v940_v26 = vmul.f32 0.33333334, %v1547_v55 }
 0x3ff   :  { %v812_v30 = vpack.c.bf16 %v803_v29, %v802_v27  ;;  %1234 = vmatprep.subr.bf16.mxu0 %v813_v28  ;;  %1266 = vmatprep.subr.bf16.mxu1 %v813_v28 }
 0x400   :  { %1235 = vmatpush3.bf16.msra.mxu0 %v813_v28  ;;  %1274 = vmatpush3.bf16.msra.mxu1 %v813_v28 }
 0x401   :  { %1236 = vmatprep.subr.bf16.mxu0 %v812_v30  ;;  %1267 = vmatprep.subr.bf16.mxu1 %v812_v30 }
 0x404   :  { %1237 = vmatpush3.bf16.msra.mxu0 %v812_v30  ;;  %1275 = vmatpush3.bf16.msra.mxu1 %v812_v30 }
 0x405   :  { %1238 = vmatprep.subr.bf16.mxu0 %v811_v9  ;;  %1268 = vmatprep.subr.bf16.mxu1 %v811_v9 }
 0x408   :  { %1239 = vmatpush3.bf16.msra.mxu0 %v811_v9  ;;  %1276 = vmatpush3.bf16.msra.mxu1 %v811_v9 }
 0x409   :  { %1240 = vmatprep.subr.bf16.mxu0 %v810_v12  ;;  %1269 = vmatprep.subr.bf16.mxu1 %v810_v12 }
 0x40c   :  { %1241 = vmatpush3.bf16.msra.mxu0 %v810_v12  ;;  %1277 = vmatpush3.bf16.msra.mxu1 %v810_v12  ;;  %v939_v12 = vmul.f32 0.33333334, %v1541_v45 }
 0x40d   :  { %1242 = vmatprep.subr.bf16.mxu0 %v809_v54  ;;  %1270 = vmatprep.subr.bf16.mxu1 %v809_v54 }
 0x410   :  { %1243 = vmatpush3.bf16.msra.mxu0 %v809_v54  ;;  %1278 = vmatpush3.bf16.msra.mxu1 %v809_v54  ;;  %v937_v54 = vmul.f32 0.33333334, %v1531_v41 }
 0x411   :  { %1244 = vmatprep.subr.bf16.mxu0 %v808_v58  ;;  %1271 = vmatprep.subr.bf16.mxu1 %v808_v58 }
 0x414   :  { %1245 = vmatpush3.bf16.msra.mxu0 %v808_v58  ;;  %1279 = vmatpush3.bf16.msra.mxu1 %v808_v58 }
 0x415   :  { %1246 = vmatprep.subr.bf16.mxu0 %v1575_v14  ;;  %1272 = vmatprep.subr.bf16.mxu1 %v1575_v14 }
 0x418   :  { %1247 = vmatpush3.bf16.msra.mxu0 %v1575_v14  ;;  %1280 = vmatpush3.bf16.msra.mxu1 %v1575_v14  ;;  %v929_v14 = vmul.f32 0.33333334, %v1515_v33  ;;  %v938_v33 = vmul.f32 0.33333334, %v1535_v16 }
 0x419   :  { %1248 = vmatprep.subr.bf16.mxu0 %v1577_v18  ;;  %1273 = vmatprep.subr.bf16.mxu1 %v1577_v18 }
 0x41c   :  { %1249 = vmatpush3.bf16.msra.mxu0 %v1577_v18  ;;  %1281 = vmatpush3.bf16.msra.mxu1 %v1577_v18 }
 0x41f   :  { %1251 = vmatmul.mubr.bf16.vlgmr.msra.gmra.mxu0 %v1492_v46  ;;  %1259 = vmatmul.mubr.bf16.vlgmr.msra.gmra.mxu1 %v1504_v50  ;;  %v927_v46 = vmul.f32 0.33333334, %v1517_v34  ;;  %v935_v50 = vmul.f32 0.33333334, %v1533_v42  ;;  %v928_v42 = vmul.f32 0.33333334, %v1521_v36 }
 0x420   :  { %1254 = vmatprep.mubr.bf16.mxu0 %v1494_v47  ;;  %1262 = vmatprep.mubr.bf16.mxu1 %v1506_v51 }
 0x427   :  { %1255 = vmatmul.mubr.bf16.gmra.mxu0 %v1498_v48  ;;  %1263 = vmatmul.mubr.bf16.gmra.mxu1 %v1510_v52  ;;  %v930_v52 = vmul.f32 0.33333334, %v1519_v35 }
 0x4df   :  { %v1252_v31 = vpop.f32.mrf.mxu0  ;;  %v1260_v32 = vpop.f32.mrf.mxu1 }
 0x4e0   :  { %v913_v56 = vmul.f32 0.6666667, %v1252_v31  ;;  %v921_v18 = vmul.f32 0.6666667, %v1260_v32 }
 0x4e1   :  { %v848_v57 = vpop.f32.mrf.mxu0  ;;  %v880_v47 = vpop.f32.mrf.mxu1 }
 0x4e2   :  { %v945_v58 = vadd.f32 %v929_v14, %v913_v56  ;;  %v953_v51 = vadd.f32 %v937_v54, %v921_v18  ;;  %v911_v59 = vmul.f32 0.6666667, %v848_v57  ;;  %v919_v48 = vmul.f32 0.6666667, %v880_v47 }
 0x4e3   :  { %v1253_v60 = vpop.f32.mrf.mxu0  ;;  %v1261_v61 = vpop.f32.mrf.mxu1 }
 0x4e4   :  { %961 = vst [vmem:[#allocation10 + $0x10] sm:$0xff] %v945_v58  ;;  %969 = vst [vmem:[#allocation10 + $0x50] sm:$0xff] %v953_v51  ;;  %v943_v41 = vadd.f32 %v927_v46, %v911_v59  ;;  %v951_v62 = vadd.f32 %v935_v50, %v919_v48  ;;  %v914_v63 = vmul.f32 0.6666667, %v1253_v60  ;;  %v922_v34 = vmul.f32 0.6666667, %v1261_v61 }
 0x4e5   :  { %v851_v1 = vpop.f32.mrf.mxu0  ;;  %v883_v2 = vpop.f32.mrf.mxu1 }
 0x4e6   :  { %959 = vst [vmem:[#allocation10] sm:$0xff] %v943_v41  ;;  %967 = vst [vmem:[#allocation10 + $0x40] sm:$0xff] %v951_v62  ;;  %v946_v3 = vadd.f32 %v930_v52, %v914_v63  ;;  %v954_v35 = vadd.f32 %v938_v33, %v922_v34  ;;  %v912_v4 = vmul.f32 0.6666667, %v851_v1  ;;  %v920_v16 = vmul.f32 0.6666667, %v883_v2 }
 0x4e7   :  { %v1256_v7 = vpop.f32.mrf.mxu0  ;;  %v1264_v8 = vpop.f32.mrf.mxu1 }
 0x4e8   :  { %962 = vst [vmem:[#allocation10 + $0x18] sm:$0xff] %v946_v3  ;;  %970 = vst [vmem:[#allocation10 + $0x58] sm:$0xff] %v954_v35  ;;  %v944_v9 = vadd.f32 %v928_v42, %v912_v4  ;;  %v952_v36 = vadd.f32 %v936_v0, %v920_v16  ;;  %v917_v10 = vmul.f32 0.6666667, %v1256_v7  ;;  %v925_v43 = vmul.f32 0.6666667, %v1264_v8 }
 0x4e9   :  { %v864_v13 = vpop.f32.mrf.mxu0  ;;  %v896_v49 = vpop.f32.mrf.mxu1 }
 0x4ea   :  { %960 = vst [vmem:[#allocation10 + $0x8] sm:$0xff] %v944_v9  ;;  %968 = vst [vmem:[#allocation10 + $0x48] sm:$0xff] %v952_v36  ;;  %v949_v15 = vadd.f32 %v933_v5, %v917_v10  ;;  %v957_v37 = vadd.f32 %v941_v6, %v925_v43  ;;  %v915_v17 = vmul.f32 0.6666667, %v864_v13  ;;  %v923_v44 = vmul.f32 0.6666667, %v896_v49 }
 0x4eb   :  { %v1257_v21 = vpop.f32.mrf.mxu0  ;;  %v1265_v22 = vpop.f32.mrf.mxu1 }
 0x4ec   :  { %965 = vst [vmem:[#allocation10 + $0x30] sm:$0xff] %v949_v15  ;;  %973 = vst [vmem:[#allocation10 + $0x70] sm:$0xff] %v957_v37  ;;  %v947_v23 = vadd.f32 %v931_v11, %v915_v17  ;;  %v955_v38 = vadd.f32 %v939_v12, %v923_v44  ;;  %v918_v24 = vmul.f32 0.6666667, %v1257_v21  ;;  %v926_v45 = vmul.f32 0.6666667, %v1265_v22 }
 0x4ed   :  { %v867_v27 = vpop.f32.mrf.mxu0  ;;  %v899_v28 = vpop.f32.mrf.mxu1 }
 0x4ee   :  { %963 = vst [vmem:[#allocation10 + $0x20] sm:$0xff] %v947_v23  ;;  %971 = vst [vmem:[#allocation10 + $0x60] sm:$0xff] %v955_v38  ;;  %v950_v39 = vadd.f32 %v934_v19, %v918_v24  ;;  %v958_v53 = vadd.f32 %v942_v20, %v926_v45  ;;  %v916_v29 = vmul.f32 0.6666667, %v867_v27  ;;  %v924_v30 = vmul.f32 0.6666667, %v899_v28 }
 0x4f0   :  { %966 = vst [vmem:[#allocation10 + $0x38] sm:$0xff] %v950_v39  ;;  %974 = vst [vmem:[#allocation10 + $0x78] sm:$0xff] %v958_v53  ;;  %v948_v14 = vadd.f32 %v932_v25, %v916_v29  ;;  %v956_v31 = vadd.f32 %v940_v26, %v924_v30 }
 0x4f2   :  { %964 = vst [vmem:[#allocation10 + $0x28] sm:$0xff] %v948_v14  ;;  %972 = vst [vmem:[#allocation10 + $0x68] sm:$0xff] %v956_v31 }
 0x4f3   :  { %1414 = shalt.err (!%p1411_p10)
}
 0x4f4   :  { %s1438_s10 = smov 128   ;;  %s1439_s11 = smov 8  }
 0x4f5   :  { %986 = dma.vmem_to_hbm [thread:$0]  %s981_s3, 2048, %s1628_s4, [#allocation4], %s1438_s10, %s1438_s10, %s1439_s11  }
 0x4f6   :  { %1429 = dma.done.wait [#allocation4], 2048  }
 0x4f7   :  { %1430 = vsyncadd [#allocation4], 4294965248 }
 0x4f8   :  { %990 = vsyncpa [#allocation3], 1 }
 0x4f9   :  { %991 = vsyncpa [#allocation6], 1 }
 0x4fa   :  { %992 = vsyncpa [#allocation9], 1 }
 0x4fb   :  { %993 = vsyncpa [#allocation4], 1 }

</bundles_post_ra>
